<compile_context>
chip_gen: v7x
topology: tpu7x:2x2x1
jax: 0.10.0
libtpu: 0.0.40
codegen_flags: <defaults>
</compile_context>

<pallas_src>
import jax
import jax.numpy as jnp
from jax import lax
from jax.experimental import pallas as pl
from jax.experimental.pallas import tpu as pltpu


OUT_DIM = 3 + 3 + 4 + 1      # 11 = pos(3) + scale(3) + rot(4) + opacity(1)
PAD_DIM = 16                 # delta / w2 padded width (weights only; negligible)


def _round_up(a, b):
    return (a + b - 1) // b * b


def _refine_kernel(x_ref, pos_ref, scl_ref, rot_ref, opa_ref,
                   w1_ref, b1_ref, w2_ref, b2_ref,
                   pos_out, scl_out, rot_out, opa_out):
    # ---- MLP hot path: two bf16 MXU matmuls with f32 accumulation, ReLU on the VPU.
    x = x_ref[...].astype(w1_ref.dtype)               # in-VMEM cast (no wrapper pass)
    h = jnp.dot(x, w1_ref[...], preferred_element_type=jnp.float32)
    h = jnp.maximum(h + b1_ref[...], 0.0)
    delta = jnp.dot(h.astype(w2_ref.dtype), w2_ref[...],
                    preferred_element_type=jnp.float32) + b2_ref[...]

    # ---- residual updates per field (delta cols: pos 0:3 | scale 3:6 | rot 6:10 | opa 10).
    pos_out[...] = pos_ref[...] + delta[:, 0:3]
    scl_out[...] = scl_ref[...] + delta[:, 3:6]
    opa_out[...] = opa_ref[...] + delta[:, 10:11]

    # F.normalize(r, dim=-1) with eps=1e-12  ==  r * rsqrt(max(sum(r*r), 1e-24)).
    r = rot_ref[...] + delta[:, 6:10]
    sumsq = jnp.sum(r * r, axis=-1, keepdims=True)
    rot_out[...] = r * lax.rsqrt(jnp.maximum(sumsq, 1e-24))   # rsqrt -> EUP slot


def sparse_gaussian_3d_refinement(fused_feature, gaussians, params, *,
                                  tile_m=2048, use_bf16=True):
    """fused_feature: (B, N, D); gaussians: dict of (B, N, k) arrays."""
    B, N, D = fused_feature.shape
    M = B * N

    # Large row tile (multiple of 16), clamped so the grid keeps >= ~8 steps
    # (software pipelining + both v7x TensorCores stay busy).
    tile = max(16, min(_round_up(tile_m, 16), _round_up(pl.cdiv(M, 8), 16)))
    grid_m = pl.cdiv(M, tile)      # partial final block handled by Pallas (no jnp.pad)

    w_dtype = jnp.bfloat16 if use_bf16 else jnp.float32

    # Native-dtype streams; reshapes are free (no HBM copy).
    x = fused_feature.reshape(M, D)
    pos = gaussians["position"].reshape(M, 3).astype(jnp.float32)
    scl = gaussians["scale"].reshape(M, 3).astype(jnp.float32)
    rot = gaussians["rotation"].reshape(M, 4).astype(jnp.float32)
    opa = gaussians["opacity"].reshape(M, 1).astype(jnp.float32)

    # Resident weights. w2/b2 zero-padded 11 -> 16 columns (tiny one-time cost).
    w1 = params["w1"].astype(w_dtype)                                      # (D, D)
    b1 = params["b1"].reshape(1, D).astype(jnp.float32)                    # (1, D)
    w2 = jnp.pad(params["w2"], ((0, 0), (0, PAD_DIM - OUT_DIM))).astype(w_dtype)
    b2 = jnp.pad(params["b2"].reshape(1, OUT_DIM),
                 ((0, 0), (0, PAD_DIM - OUT_DIM))).astype(jnp.float32)

    x_bytes = jnp.dtype(x.dtype).itemsize
    w_bytes = jnp.dtype(w_dtype).itemsize
    cost = pl.CostEstimate(
        flops=2 * M * D * (D + PAD_DIM),
        transcendentals=M,                               # one rsqrt per row
        bytes_accessed=(M * D * x_bytes                  # x stream
                        + 2 * M * OUT_DIM * 4            # gaussians in + out
                        + D * D * w_bytes + D * PAD_DIM * w_bytes
                        + (D + PAD_DIM) * 4))

    row = lambda i: (i, 0)
    rep = lambda i: (0, 0)

    pos_o, scl_o, rot_o, opa_o = pl.pallas_call(
        _refine_kernel,
        out_shape=(jax.ShapeDtypeStruct((M, 3), jnp.float32),
                   jax.ShapeDtypeStruct((M, 3), jnp.float32),
                   jax.ShapeDtypeStruct((M, 4), jnp.float32),
                   jax.ShapeDtypeStruct((M, 1), jnp.float32)),
        grid_spec=pltpu.PrefetchScalarGridSpec(
            num_scalar_prefetch=0,
            grid=(grid_m,),
            in_specs=[
                pl.BlockSpec((tile, D), row),        # x (streamed, native dtype)
                pl.BlockSpec((tile, 3), row),        # position
                pl.BlockSpec((tile, 3), row),        # scale
                pl.BlockSpec((tile, 4), row),        # rotation
                pl.BlockSpec((tile, 1), row),        # opacity
                pl.BlockSpec((D, D), rep),           # w1 (resident)
                pl.BlockSpec((1, D), rep),           # b1
                pl.BlockSpec((D, PAD_DIM), rep),     # w2 (padded, bf16)
                pl.BlockSpec((1, PAD_DIM), rep),     # b2 (padded, f32)
            ],
            out_specs=(pl.BlockSpec((tile, 3), row),
                       pl.BlockSpec((tile, 3), row),
                       pl.BlockSpec((tile, 4), row),
                       pl.BlockSpec((tile, 1), row)),
        ),
        compiler_params=pltpu.CompilerParams(
            dimension_semantics=("parallel",)),
        cost_estimate=cost,
    )(x, pos, scl, rot, opa, w1, b1, w2, b2)

    return {
        "position": pos_o.reshape(B, N, 3),
        "scale": scl_o.reshape(B, N, 3),
        "rotation": rot_o.reshape(B, N, 4),
        "opacity": opa_o.reshape(B, N, 1),
    }


def _reference(fused_feature, gaussians, params, *, use_bf16=True):
    # Mirrors the kernel's bf16 cast of the MXU inputs; f32 everywhere else.
    w_dtype = jnp.bfloat16 if use_bf16 else jnp.float32
    h = jnp.dot(fused_feature.astype(w_dtype), params["w1"].astype(w_dtype),
                preferred_element_type=jnp.float32) + params["b1"]
    h = jnp.maximum(h, 0.0)
    delta = jnp.dot(h.astype(w_dtype), params["w2"].astype(w_dtype),
                    preferred_element_type=jnp.float32) + params["b2"]
    d_pos, d_scl, d_rot, d_opa = (delta[..., 0:3], delta[..., 3:6],
                                  delta[..., 6:10], delta[..., 10:11])
    r = gaussians["rotation"] + d_rot
    n = jnp.maximum(jnp.linalg.norm(r, axis=-1, keepdims=True), 1e-12)
    return {
        "position": gaussians["position"] + d_pos,
        "scale": gaussians["scale"] + d_scl,
        "rotation": r / n,
        "opacity": gaussians["opacity"] + d_opa,
    }


if __name__ == "__main__":
    key = jax.random.PRNGKey(0)

    def make_case(case_key, B, N, D):
        keys = jax.random.split(case_key, 9)
        fused = jax.random.normal(keys[0], (B, N, D), jnp.float32)
        gaussians = {
            "position": jax.random.normal(keys[1], (B, N, 3), jnp.float32),
            "scale": jax.random.normal(keys[2], (B, N, 3), jnp.float32),
            "rotation": jax.random.normal(keys[3], (B, N, 4), jnp.float32),
            "opacity": jax.random.normal(keys[4], (B, N, 1), jnp.float32),
        }
        # nn.Linear-style uniform(-1/sqrt(fan_in), +1/sqrt(fan_in)) init.
        bound = 1.0 / (D ** 0.5)
        params = {
            "w1": jax.random.uniform(keys[5], (D, D), jnp.float32, -bound, bound),
            "b1": jax.random.uniform(keys[6], (D,), jnp.float32, -bound, bound),
            "w2": jax.random.uniform(keys[7], (D, OUT_DIM), jnp.float32, -bound, bound),
            "b2": jax.random.uniform(keys[8], (OUT_DIM,), jnp.float32, -bound, bound),
        }
        return fused, gaussians, params

    k1, k2 = jax.random.split(key)
    # Case 1: M=16 (exact tile multiple).  Case 2: M=13 (ragged -> partial final block).
    for case_key, (B, N, D) in ((k1, (2, 8, 32)), (k2, (1, 13, 32))):
        fused, gaussians, params = make_case(case_key, B, N, D)
        out = jax.block_until_ready(
            sparse_gaussian_3d_refinement(fused, gaussians, params))
        ref = _reference(fused, gaussians, params)
        for name in ("position", "scale", "rotation", "opacity"):
            assert out[name].shape == ref[name].shape, \
                (name, out[name].shape, ref[name].shape)
            assert jnp.allclose(out[name], ref[name], atol=1e-3, rtol=1e-3), name

    print("KERNEL_OK")
</pallas_src>

<mosaic_0001>
module attributes {stable_mosaic.version = 11 : i64} {
  func.func @_refine_kernel(%arg0: i32, %arg1: memref<16x32xf32, #tpu.memory_space<vmem>>, %arg2: memref<16x3xf32, #tpu.memory_space<vmem>>, %arg3: memref<16x3xf32, #tpu.memory_space<vmem>>, %arg4: memref<16x4xf32, #tpu.memory_space<vmem>>, %arg5: memref<16x1xf32, #tpu.memory_space<vmem>>, %arg6: memref<32x32xbf16, #tpu.memory_space<vmem>>, %arg7: memref<1x32xf32, #tpu.memory_space<vmem>>, %arg8: memref<32x16xbf16, #tpu.memory_space<vmem>>, %arg9: memref<1x16xf32, #tpu.memory_space<vmem>>, %arg10: memref<16x3xf32, #tpu.memory_space<vmem>>, %arg11: memref<16x3xf32, #tpu.memory_space<vmem>>, %arg12: memref<16x4xf32, #tpu.memory_space<vmem>>, %arg13: memref<16x1xf32, #tpu.memory_space<vmem>>) attributes {dimension_semantics = [#tpu.dimension_semantics<parallel>], iteration_bounds = array<i64: 1>, scalar_prefetch = 0 : i64, scratch_operands = 0 : i64, tpu.core_type = #tpu.core_type<tc>, window_params = [{transform_indices = @transform_0, window_bounds = array<i64: 16, 32>}, {transform_indices = @transform_1, window_bounds = array<i64: 16, 3>}, {transform_indices = @transform_2, window_bounds = array<i64: 16, 3>}, {transform_indices = @transform_3, window_bounds = array<i64: 16, 4>}, {transform_indices = @transform_4, window_bounds = array<i64: 16, 1>}, {pipeline_mode = #tpu.pipeline_mode<synchronous>, transform_indices = @transform_5, window_bounds = array<i64: 32, 32>}, {pipeline_mode = #tpu.pipeline_mode<synchronous>, transform_indices = @transform_6, window_bounds = array<i64: 1, 32>}, {pipeline_mode = #tpu.pipeline_mode<synchronous>, transform_indices = @transform_7, window_bounds = array<i64: 32, 16>}, {pipeline_mode = #tpu.pipeline_mode<synchronous>, transform_indices = @transform_8, window_bounds = array<i64: 1, 16>}, {transform_indices = @transform_9, window_bounds = array<i64: 16, 3>}, {transform_indices = @transform_10, window_bounds = array<i64: 16, 3>}, {transform_indices = @transform_11, window_bounds = array<i64: 16, 4>}, {transform_indices = @transform_12, window_bounds = array<i64: 16, 1>}]} {
    %c0 = arith.constant 0 : index
    %c0_0 = arith.constant 0 : index
    %0 = vector.load %arg1[%c0, %c0_0] : memref<16x32xf32, #tpu.memory_space<vmem>>, vector<16x32xf32>
    %1 = arith.truncf %0 : vector<16x32xf32> to vector<16x32xbf16>
    %c0_1 = arith.constant 0 : index
    %c0_2 = arith.constant 0 : index
    %2 = vector.load %arg6[%c0_1, %c0_2] : memref<32x32xbf16, #tpu.memory_space<vmem>>, vector<32x32xbf16>
    %cst = arith.constant dense<0.000000e+00> : vector<16x32xf32>
    %3 = tpu.matmul %1, %2, %cst {dimension_numbers = #tpu.dot_dimension_numbers<[1], [0], [0], [1], [0, 0, 1, 1], [], []>} : vector<16x32xbf16>, vector<32x32xbf16>, vector<16x32xf32> -> vector<16x32xf32>
    %c0_3 = arith.constant 0 : index
    %c0_4 = arith.constant 0 : index
    %4 = vector.load %arg7[%c0_3, %c0_4] : memref<1x32xf32, #tpu.memory_space<vmem>>, vector<1x32xf32>
    %5 = vector.broadcast %4 : vector<1x32xf32> to vector<16x32xf32>
    %6 = arith.addf %3, %5 : vector<16x32xf32>
    %cst_5 = arith.constant 0.000000e+00 : f32
    %7 = vector.broadcast %cst_5 : f32 to vector<16x32xf32>
    %8 = arith.maximumf %6, %7 : vector<16x32xf32>
    %9 = arith.truncf %8 : vector<16x32xf32> to vector<16x32xbf16>
    %c0_6 = arith.constant 0 : index
    %c0_7 = arith.constant 0 : index
    %10 = vector.load %arg8[%c0_6, %c0_7] : memref<32x16xbf16, #tpu.memory_space<vmem>>, vector<32x16xbf16>
    %cst_8 = arith.constant dense<0.000000e+00> : vector<16x16xf32>
    %11 = tpu.matmul %9, %10, %cst_8 {dimension_numbers = #tpu.dot_dimension_numbers<[1], [0], [0], [1], [0, 0, 1, 1], [], []>} : vector<16x32xbf16>, vector<32x16xbf16>, vector<16x16xf32> -> vector<16x16xf32>
    %c0_9 = arith.constant 0 : index
    %c0_10 = arith.constant 0 : index
    %12 = vector.load %arg9[%c0_9, %c0_10] : memref<1x16xf32, #tpu.memory_space<vmem>>, vector<1x16xf32>
    %13 = vector.broadcast %12 : vector<1x16xf32> to vector<16x16xf32>
    %14 = arith.addf %11, %13 : vector<16x16xf32>
    %c0_11 = arith.constant 0 : index
    %c0_12 = arith.constant 0 : index
    %15 = vector.load %arg2[%c0_11, %c0_12] : memref<16x3xf32, #tpu.memory_space<vmem>>, vector<16x3xf32>
    %16 = vector.extract_strided_slice %14 {offsets = [0, 0], sizes = [16, 3], strides = [1, 1]} : vector<16x16xf32> to vector<16x3xf32>
    %17 = arith.addf %15, %16 : vector<16x3xf32>
    %c0_13 = arith.constant 0 : index
    %c0_14 = arith.constant 0 : index
    %18 = vector.load %arg10[%c0_13, %c0_14] : memref<16x3xf32, #tpu.memory_space<vmem>>, vector<16x3xf32>
    tpu.vector_store %arg10[%c0_13, %c0_14], %17 {strides = array<i32>} : memref<16x3xf32, #tpu.memory_space<vmem>>, vector<16x3xf32>,
    %c0_15 = arith.constant 0 : index
    %c0_16 = arith.constant 0 : index
    %19 = vector.load %arg3[%c0_15, %c0_16] : memref<16x3xf32, #tpu.memory_space<vmem>>, vector<16x3xf32>
    %20 = vector.extract_strided_slice %14 {offsets = [0, 3], sizes = [16, 3], strides = [1, 1]} : vector<16x16xf32> to vector<16x3xf32>
    %21 = arith.addf %19, %20 : vector<16x3xf32>
    %c0_17 = arith.constant 0 : index
    %c0_18 = arith.constant 0 : index
    %22 = vector.load %arg11[%c0_17, %c0_18] : memref<16x3xf32, #tpu.memory_space<vmem>>, vector<16x3xf32>
    tpu.vector_store %arg11[%c0_17, %c0_18], %21 {strides = array<i32>} : memref<16x3xf32, #tpu.memory_space<vmem>>, vector<16x3xf32>,
    %c0_19 = arith.constant 0 : index
    %c0_20 = arith.constant 0 : index
    %23 = vector.load %arg5[%c0_19, %c0_20] : memref<16x1xf32, #tpu.memory_space<vmem>>, vector<16x1xf32>
    %24 = vector.extract_strided_slice %14 {offsets = [0, 10], sizes = [16, 1], strides = [1, 1]} : vector<16x16xf32> to vector<16x1xf32>
    %25 = arith.addf %23, %24 : vector<16x1xf32>
    %c0_21 = arith.constant 0 : index
    %c0_22 = arith.constant 0 : index
    %26 = vector.load %arg13[%c0_21, %c0_22] : memref<16x1xf32, #tpu.memory_space<vmem>>, vector<16x1xf32>
    tpu.vector_store %arg13[%c0_21, %c0_22], %25 {strides = array<i32>} : memref<16x1xf32, #tpu.memory_space<vmem>>, vector<16x1xf32>,
    %c0_23 = arith.constant 0 : index
    %c0_24 = arith.constant 0 : index
    %27 = vector.load %arg4[%c0_23, %c0_24] : memref<16x4xf32, #tpu.memory_space<vmem>>, vector<16x4xf32>
    %28 = vector.extract_strided_slice %14 {offsets = [0, 6], sizes = [16, 4], strides = [1, 1]} : vector<16x16xf32> to vector<16x4xf32>
    %29 = arith.addf %27, %28 : vector<16x4xf32>
    %30 = arith.mulf %29, %29 : vector<16x4xf32>
    %cst_25 = arith.constant dense<0.000000e+00> : vector<16xf32>
    %31 = vector.multi_reduction <add>, %30, %cst_25 [1] : vector<16x4xf32> to vector<16xf32>
    %32 = vector.shape_cast %31 : vector<16xf32> to vector<16x1xf32>
    %cst_26 = arith.constant 1.000000e-24 : f32
    %33 = vector.broadcast %cst_26 : f32 to vector<16x1xf32>
    %34 = arith.maximumf %32, %33 : vector<16x1xf32>
    %35 = math.rsqrt %34 : vector<16x1xf32>
    %36 = vector.broadcast %35 : vector<16x1xf32> to vector<16x4xf32>
    %37 = arith.mulf %29, %36 : vector<16x4xf32>
    %c0_27 = arith.constant 0 : index
    %c0_28 = arith.constant 0 : index
    %38 = vector.load %arg12[%c0_27, %c0_28] : memref<16x4xf32, #tpu.memory_space<vmem>>, vector<16x4xf32>
    tpu.vector_store %arg12[%c0_27, %c0_28], %37 {strides = array<i32>} : memref<16x4xf32, #tpu.memory_space<vmem>>, vector<16x4xf32>,
    return
  }
  func.func @transform_0(%arg0: i32) -> (i32, i32) {
    %c0_i32 = arith.constant 0 : i32
    %c0_i32_0 = arith.constant 0 : i32
    return %arg0, %c0_i32 : i32, i32
  }
  func.func @transform_1(%arg0: i32) -> (i32, i32) {
    %c0_i32 = arith.constant 0 : i32
    %c0_i32_0 = arith.constant 0 : i32
    return %arg0, %c0_i32 : i32, i32
  }
  func.func @transform_2(%arg0: i32) -> (i32, i32) {
    %c0_i32 = arith.constant 0 : i32
    %c0_i32_0 = arith.constant 0 : i32
    return %arg0, %c0_i32 : i32, i32
  }
  func.func @transform_3(%arg0: i32) -> (i32, i32) {
    %c0_i32 = arith.constant 0 : i32
    %c0_i32_0 = arith.constant 0 : i32
    return %arg0, %c0_i32 : i32, i32
  }
  func.func @transform_4(%arg0: i32) -> (i32, i32) {
    %c0_i32 = arith.constant 0 : i32
    %c0_i32_0 = arith.constant 0 : i32
    return %arg0, %c0_i32 : i32, i32
  }
  func.func @transform_5(%arg0: i32) -> (i32, i32) {
    %c0_i32 = arith.constant 0 : i32
    %c0_i32_0 = arith.constant 0 : i32
    %c0_i32_1 = arith.constant 0 : i32
    return %c0_i32, %c0_i32_0 : i32, i32
  }
  func.func @transform_6(%arg0: i32) -> (i32, i32) {
    %c0_i32 = arith.constant 0 : i32
    %c0_i32_0 = arith.constant 0 : i32
    %c0_i32_1 = arith.constant 0 : i32
    return %c0_i32, %c0_i32_0 : i32, i32
  }
  func.func @transform_7(%arg0: i32) -> (i32, i32) {
    %c0_i32 = arith.constant 0 : i32
    %c0_i32_0 = arith.constant 0 : i32
    %c0_i32_1 = arith.constant 0 : i32
    return %c0_i32, %c0_i32_0 : i32, i32
  }
  func.func @transform_8(%arg0: i32) -> (i32, i32) {
    %c0_i32 = arith.constant 0 : i32
    %c0_i32_0 = arith.constant 0 : i32
    %c0_i32_1 = arith.constant 0 : i32
    return %c0_i32, %c0_i32_0 : i32, i32
  }
  func.func @transform_9(%arg0: i32) -> (i32, i32) {
    %c0_i32 = arith.constant 0 : i32
    %c0_i32_0 = arith.constant 0 : i32
    return %arg0, %c0_i32 : i32, i32
  }
  func.func @transform_10(%arg0: i32) -> (i32, i32) {
    %c0_i32 = arith.constant 0 : i32
    %c0_i32_0 = arith.constant 0 : i32
    return %arg0, %c0_i32 : i32, i32
  }
  func.func @transform_11(%arg0: i32) -> (i32, i32) {
    %c0_i32 = arith.constant 0 : i32
    %c0_i32_0 = arith.constant 0 : i32
    return %arg0, %c0_i32 : i32, i32
  }
  func.func @transform_12(%arg0: i32) -> (i32, i32) {
    %c0_i32 = arith.constant 0 : i32
    %c0_i32_0 = arith.constant 0 : i32
    return %arg0, %c0_i32 : i32, i32
  }
}

</mosaic_0001>

<bundles_post_ra>
// kernel: tpu_custom_call.1
= control target key start
LH: loop header
LB: loop body
LE: loop exit
PB: predicated region body
PF: predicated region fallthrough
CT: control target
= control target key end

     0   :  { %v298_v0 = vmov 0.0   ;;  %vm299_vm0 = vmmov 0   ;;  %vm63_vm1 = vcmask 261120   ;;  %vm182_vm2 = vcmask 23552   ;;  %s300_s19 = smov 122   ;;  %s301_s23 = smov 125   ;;  %s452_s5 = inlined_call_operand.vmem [shape: bf16[32,32], index: 5, kind: input, shape index: {}]   ;;  %s453_s0 = inlined_call_operand.vmem [shape: f32[16,32], index: 0, kind: input, shape index: {}]   ;;  %s454_s7 = inlined_call_operand.vmem [shape: bf16[32,16], index: 7, kind: input, shape index: {}]   ;;  %s455_s6 = inlined_call_operand.vmem [shape: f32[1,32], index: 6, kind: input, shape index: {}]   ;;  %s456_s8 = inlined_call_operand.vmem [shape: f32[1,16], index: 8, kind: input, shape index: {}]   ;;  %s457_s1 = inlined_call_operand.vmem [shape: f32[16,3], index: 1, kind: input, shape index: {}]   ;;  %s458_s9 = inlined_call_operand.vmem [shape: f32[16,3], index: 9, kind: output, shape index: {0}]   ;;  %s459_s3 = inlined_call_operand.vmem [shape: f32[16,4], index: 3, kind: input, shape index: {}]   ;;  %s460_s2 = inlined_call_operand.vmem [shape: f32[16,3], index: 2, kind: input, shape index: {}]   ;;  %s461_s4 = inlined_call_operand.vmem [shape: f32[16,1], index: 4, kind: input, shape index: {}]   ;;  %s462_s10 = inlined_call_operand.vmem [shape: f32[16,3], index: 10, kind: output, shape index: {1}]   ;;  %s463_s12 = inlined_call_operand.vmem [shape: f32[16,1], index: 12, kind: output, shape index: {3}]   ;;  %s464_s11 = inlined_call_operand.vmem [shape: f32[16,4], index: 11, kind: output, shape index: {2}]  }
   0x1   :  { %269 = vmatprep.subr.bf16.mxu0 %v298_v0  ;;  %v290_v1 = vld [vmem:[%s452_s5] sm:$0xff]   ;;  %273 = vmatprep.mubr.msk.bf16.mxu0 %vm299_vm0, %v298_v0  ;;  %v291_v2 = vld [vmem:[%s452_s5 + $0x8] sm:$0xff]   ;;  %vm224_vm3 = vcmask 31744   ;;  %vm209_vm4 = vcmask 7168  }
   0x2   :  { %277 = vmatprep.subr.bf16.mxu1 %v298_v0  ;;  %281 = vmatprep.mubr.msk.bf16.mxu1 %vm299_vm0, %v298_v0  ;;  %v37_v3 = vld [vmem:[%s453_s0] sm:$0xff]  ;;  %v38_v4 = vld [vmem:[%s453_s0 + $0x8] sm:$0xff] }
   0x3   :  { %270 = vmatpush3.bf16.msra.mxu0 %v290_v1  ;;  %v39_v5 = vpack.c.bf16 %v38_v4, %v37_v3  ;;  %v292_v6 = vld [vmem:[%s454_s7] sm:$0xff]   ;;  %v293_v7 = vld [vmem:[%s454_s7 + $0x8] sm:$0xff]  }
   0x4   :  { %271 = vmatprep.subr.bf16.mxu0 %v298_v0  ;;  %278 = vmatpush3.bf16.msra.mxu1 %v292_v6  ;;  %v255_v8 = vld [vmem:[%s455_s6] ss:$0 sm:$0xff]  ;;  %v179_v24 = vld [vmem:[%s457_s1 + $0x8] sm:$0xff] }
   0x5   :  { %279 = vmatprep.subr.bf16.mxu1 %v298_v0  ;;  %v259_v18 = vld [vmem:[%s456_s8] ss:$0 sm:$0xff]  ;;  %v213_v32 = vld [vmem:[%s459_s3 + $0x8] sm:$0xff] }
   0x6   :  { %v178_v20 = vld [vmem:[%s457_s1] sm:$0xff]  ;;  %s302_s1 = smov 118   ;;  %v200_v45 = vld [vmem:[%s461_s4 + $0x8] sm:$0xff] }
   0x7   :  { %272 = vmatpush3.bf16.msra.mxu0 %v291_v2  ;;  %v212_v29 = vld [vmem:[%s459_s3] sm:$0xff]  ;;  %v186_v52 = vld [vmem:[%s460_s2 + $0x8] sm:$0xff] }
   0x8   :  { %280 = vmatpush3.bf16.msra.mxu1 %v293_v7  ;;  %v185_v37 = vld [vmem:[%s460_s2] sm:$0xff] }
   0x9   :  { %v199_v42 = vld [vmem:[%s461_s4] sm:$0xff] }
   0xa   :  { %274 = vmatmul.mubr.msk.bf16.vlgmr.msra.gmra.mrb[0].mxu0 %vm63_vm1, %v39_v5 }
  0xdd   :  { %v101_v9 = vpop.f32.mrb[0].mxu0 }
  0xde   :  { %v102_v10 = vadd.f32 %v255_v8, %v101_v9  ;;  %v275_v11 = vpop.f32.mrb[1].mxu0 }
  0xdf   :  { %v104_v12 = vpop.f32.mrb[2].mxu0 }
  0xe0   :  { %v105_v13 = vadd.f32 %v255_v8, %v104_v12  ;;  %v276_v14 = vpop.f32.mrb[3].mxu0  ;;  %v108_v15 = vmax.f32 %v102_v10, 0.0 }
  0xe2   :  { %v109_v16 = vmax.f32 %v105_v13, 0.0 }
  0xe4   :  { %v110_v17 = vpack.c.bf16 %v109_v16, %v108_v15 }
  0xe6   :  { %282 = vmatmul.mubr.msk.bf16.vlgmr.msra.gmra.mrb[0].mxu1 %vm63_vm1, %v110_v17 }
 0x1b9   :  { %v171_v19 = vpop.f32.mrb[0].mxu1 }
 0x1ba   :  { %v172_v21 = vadd.f32 %v259_v18, %v171_v19  ;;  %v283_v22 = vpop.f32.mrb[1].mxu1 }
 0x1bb   :  { %v174_v23 = vpop.f32.mrb[2].mxu1 }
 0x1bc   :  { %v180_v25 = vadd.f32 %v178_v20, %v172_v21  ;;  %v175_v26 = vadd.f32 %v259_v18, %v174_v23  ;;  %214 = vrot.lane.b32.xlu0 %v172_v21, %s300_s19  ;;  %v284_v27 = vpop.f32.mrb[3].mxu1 }
 0x1be   :  { %v181_v28 = vadd.f32 %v179_v24, %v175_v26  ;;  %183 = vst.msk [vmem:[%s458_s9] sm:$0xff] %vm182_vm2, %v180_v25 }
 0x1c0   :  { %216 = vrot.lane.b32.xlu0 %v175_v26, %s300_s19  ;;  %184 = vst.msk [vmem:[%s458_s9 + $0x8] sm:$0xff] %vm182_vm2, %v181_v28 }
 0x1c4   :  { %189 = vrot.lane.b32.xlu0 %v172_v21, %s301_s23 }
 0x1c8   :  { %201 = vrot.lane.b32.xlu0 %v172_v21, %s302_s1 }
 0x1cc   :  { %203 = vrot.lane.b32.xlu0 %v175_v26, %s302_s1 }
 0x22e   :  { %v215_v30 = vpop.permute.xlu0 %214 }
 0x22f   :  { %v220_v31 = vadd.f32 %v215_v30, %v212_v29 }
 0x231   :  { %v222_v33 = vmul.f32 %v220_v31, %v220_v31 }
 0x232   :  { %v217_v34 = vpop.permute.xlu0 %216 }
 0x233   :  { %v221_v35 = vadd.f32 %v217_v34, %v213_v32  ;;  %v225_v36 = vsel %vm224_vm3, %v222_v33, 0.0 }
 0x234   :  { %226 = vadd.xlane.f32.xlu1 %v225_v36 }
 0x235   :  { %v223_v38 = vmul.f32 %v221_v35, %v221_v35 }
 0x236   :  { %v190_v39 = vpop.permute.xlu0 %189 }
 0x237   :  { %v195_v40 = vadd.f32 %v190_v39, %v185_v37  ;;  %v228_v41 = vsel %vm224_vm3, %v223_v38, 0.0 }
 0x238   :  { %229 = vadd.xlane.f32.xlu1 %v228_v41 }
 0x239   :  { %197 = vst.msk [vmem:[%s462_s10] sm:$0xff] %vm182_vm2, %v195_v40 }
 0x23a   :  { %v202_v43 = vpop.permute.xlu0 %201 }
 0x23b   :  { %v207_v44 = vadd.f32 %v202_v43, %v199_v42 }
 0x23d   :  { %210 = vst.msk [vmem:[%s463_s12] sm:$0xff] %vm209_vm4, %v207_v44 }
 0x23e   :  { %v204_v46 = vpop.permute.xlu0 %203 }
 0x23f   :  { %v208_v47 = vadd.f32 %v204_v46, %v200_v45 }
 0x241   :  { %211 = vst.msk [vmem:[%s463_s12 + $0x8] sm:$0xff] %vm209_vm4, %v208_v47 }
 0x249   :  { %191 = vrot.lane.b32.xlu1 %v175_v26, %s301_s23 }
 0x2c1   :  { %v227_v48 = vpop.xlane.xlu1 %226 }
 0x2c2   :  { %v231_v49 = vmax.f32 %v227_v48, 1e-24 }
 0x2c4   :  { %294 = vrsqrt.f32 %v231_v49 }
 0x2c5   :  { %v230_v50 = vpop.xlane.xlu1 %229 }
 0x2c6   :  { %v232_v51 = vmax.f32 %v230_v50, 1e-24 }
 0x2c8   :  { %296 = vrsqrt.f32 %v232_v51 }
 0x2c9   :  { %v192_v53 = vpop.permute.xlu1 %191 }
 0x2ca   :  { %v196_v54 = vadd.f32 %v192_v53, %v186_v52 }
 0x2cc   :  { %198 = vst.msk [vmem:[%s462_s10 + $0x8] sm:$0xff] %vm182_vm2, %v196_v54 }
 0x2ce   :  { %v295_v55 = vpop.eup %294 }
 0x2cf   :  { %v235_v56 = vmul.f32 %v295_v55, %v220_v31 }
 0x2d1   :  { %237 = vst.msk [vmem:[%s464_s11] sm:$0xff] %vm224_vm3, %v235_v56 }
 0x2d2   :  { %v297_v57 = vpop.eup %296 }
 0x2d3   :  { %v236_v58 = vmul.f32 %v297_v57, %v221_v35 }
 0x2d5   :  { %238 = vst.msk [vmem:[%s464_s11 + $0x8] sm:$0xff] %vm224_vm3, %v236_v58 }

</bundles_post_ra>
